<compile_context>
chip_gen: v5e
topology: v5e:2x2
jax: 0.10.0
libtpu: 0.0.40
codegen_flags: <defaults>
</compile_context>

<pallas_src>
import functools

import jax
import jax.numpy as jnp
from jax.experimental import pallas as pl
from jax.experimental.pallas import tpu as pltpu


# ----------------------------------------------------------------------------
# RoPE tables
# ----------------------------------------------------------------------------
def rope_tables(seq_len, head_dim):
    """Standard ESM-style rotate-half tables, float32, shape (N, head_dim)."""
    inv_freq = 1.0 / (10000.0 ** (jnp.arange(0, head_dim, 2, dtype=jnp.float32)
                                  / head_dim))
    t = jnp.arange(seq_len, dtype=jnp.float32)
    freqs = jnp.outer(t, inv_freq)                       # (N, Dh/2)
    emb = jnp.concatenate([freqs, freqs], axis=-1)       # (N, Dh)
    return jnp.cos(emb), jnp.sin(emb)


_ROLL_MATCHES_NP = None


def _roll_matches_np_roll():
    """One-off device probe: does pltpu.roll follow np.roll convention
    (out[i] = x[i - shift])?  The RoPE sin tables are built to match, so the
    fused rotation is correct under either convention."""
    global _ROLL_MATCHES_NP
    if _ROLL_MATCHES_NP is None:
        def probe_kernel(x_ref, o_ref):
            o_ref[...] = pltpu.roll(x_ref[...], shift=1, axis=1)

        x = jnp.zeros((8, 128), jnp.float32).at[0, 0].set(1.0)
        y = pl.pallas_call(
            probe_kernel,
            out_shape=jax.ShapeDtypeStruct((8, 128), jnp.float32))(x)
        _ROLL_MATCHES_NP = bool(y[0, 1] == 1.0)
    return _ROLL_MATCHES_NP


def build_rope_lane_tables(seq_len, head_dim, num_heads):
    """Expand cos/sin to lane-dense (N, C) tables (tiled per head) with the
    rotate-half sign and head-boundary masking folded into two sin tables, so
    in-kernel RoPE is:
        x*cos + roll(x, +Dh/2)*sin_a + roll(x, -Dh/2)*sin_b
    Rolls that cross a head boundary land on zeroed sin entries."""
    cos, sin = rope_tables(seq_len, head_dim)            # (N, Dh) f32
    dh2 = head_dim // 2
    d = jnp.arange(head_dim, dtype=jnp.float32)
    m_lo = (d < dh2).astype(jnp.float32)                 # first half of each head
    m_hi = 1.0 - m_lo
    sin_back = sin * m_hi      # pairs with rot[p] = x[p - dh2]  (sign +1, d >= dh2)
    sin_fwd = -sin * m_lo      # pairs with rot[p] = x[p + dh2]  (sign -1, d <  dh2)
    if _roll_matches_np_roll():
        sin_a, sin_b = sin_back, sin_fwd   # shift=+dh2 looks "back" under np.roll
    else:
        sin_a, sin_b = sin_fwd, sin_back
    tile = lambda t: jnp.tile(t, (1, num_heads))          # (N, C)
    return tile(cos), tile(sin_a), tile(sin_b)


# ----------------------------------------------------------------------------
# Kernel 1: QKV projection  qkv = x @ Wqkv^T + b   (row-tiled, lane dim = 3C)
# ----------------------------------------------------------------------------
def qkv_kernel(x_ref, w_ref, b_ref, o_ref):
    # w is (3C, C) torch layout; contract dim 1 of both operands so the MXU
    # consumes the transposed RHS directly (no wrapper-side transpose).
    y = jax.lax.dot_general(x_ref[...], w_ref[...], (((1,), (1,)), ((), ())),
                            preferred_element_type=jnp.float32)
    o_ref[...] = (y + b_ref[...]).astype(o_ref.dtype)


def qkv_linear(x, w, b, *, tm=128):
    M, K = x.shape
    Nout = w.shape[0]
    tm = min(tm, M)
    flops = 2 * M * K * Nout
    bytes_acc = (x.size + w.size + b.size + M * Nout) * 4
    return pl.pallas_call(
        qkv_kernel,
        out_shape=jax.ShapeDtypeStruct((M, Nout), x.dtype),
        grid_spec=pltpu.PrefetchScalarGridSpec(
            num_scalar_prefetch=0,
            grid=(pl.cdiv(M, tm),),
            in_specs=[
                pl.BlockSpec((tm, K), lambda i: (i, 0)),      # x row tile
                pl.BlockSpec((Nout, K), lambda i: (0, 0)),    # W resident (torch layout)
                pl.BlockSpec((1, Nout), lambda i: (0, 0)),    # bias
            ],
            out_specs=pl.BlockSpec((tm, Nout), lambda i: (i, 0)),
        ),
        compiler_params=pltpu.CompilerParams(dimension_semantics=("parallel",)),
        cost_estimate=pl.CostEstimate(flops=int(flops), transcendentals=0,
                                      bytes_accessed=int(bytes_acc)),
    )(x, w, b.reshape(1, Nout))


# ----------------------------------------------------------------------------
# Kernel 2: per-batch attention, all heads folded, RoPE fused in the prologue
# ----------------------------------------------------------------------------
def attn_kernel(qkv_ref, cos_ref, sa_ref, sb_ref, o_ref, *,
                num_heads, head_dim, scale):
    C = num_heads * head_dim
    dh2 = head_dim // 2
    qkv = qkv_ref[0]                                   # (N, 3C)
    cos = cos_ref[...]
    sa = sa_ref[...]
    sb = sb_ref[...]

    def rope(t):
        # Lane-dense rotate-half over all heads at once: two XLU rolls by
        # +/- head_dim/2, sign & head-boundary masking pre-folded into sa/sb.
        return (t * cos
                + pltpu.roll(t, shift=dh2, axis=1) * sa
                + pltpu.roll(t, shift=C - dh2, axis=1) * sb)

    q = rope(qkv[:, 0:C].astype(jnp.float32)) * scale   # fold 1/sqrt(Dh) into q
    k = rope(qkv[:, C:2 * C].astype(jnp.float32))
    v = qkv[:, 2 * C:3 * C].astype(jnp.float32)

    # TODO(synk): padding_mask not supported (demo passes None).
    outs = []
    for h in range(num_heads):                           # static unrolled loop
        sl = slice(h * head_dim, (h + 1) * head_dim)
        s = jax.lax.dot_general(q[:, sl], k[:, sl], (((1,), (1,)), ((), ())),
                                preferred_element_type=jnp.float32)
        s = s - jnp.max(s, axis=-1, keepdims=True)
        p = jnp.exp(s)
        p = p * pl.reciprocal(jnp.sum(p, axis=-1, keepdims=True), approx=True)
        outs.append(jnp.dot(p, v[:, sl], preferred_element_type=jnp.float32))
    # lane-dense (N, C) store
    o_ref[0] = jnp.concatenate(outs, axis=-1).astype(o_ref.dtype)


def attention(qkv, cos, sin_a, sin_b, *, num_heads, scale):
    """qkv: (B, N, 3C); cos/sin_a/sin_b: (N, C). Returns (B, N, C)."""
    B, N, C3 = qkv.shape
    C = C3 // 3
    head_dim = C // num_heads
    kernel = functools.partial(attn_kernel, num_heads=num_heads,
                               head_dim=head_dim, scale=scale)
    flops = 4 * B * num_heads * N * N * head_dim
    bytes_acc = (qkv.size + B * N * C + 3 * N * C) * 4
    return pl.pallas_call(
        kernel,
        out_shape=jax.ShapeDtypeStruct((B, N, C), qkv.dtype),
        grid_spec=pltpu.PrefetchScalarGridSpec(
            num_scalar_prefetch=0,
            grid=(B,),
            in_specs=[
                pl.BlockSpec((1, N, C3), lambda b: (b, 0, 0)),   # qkv for batch b
                pl.BlockSpec((N, C), lambda b: (0, 0)),          # cos (VMEM resident)
                pl.BlockSpec((N, C), lambda b: (0, 0)),          # sin_a
                pl.BlockSpec((N, C), lambda b: (0, 0)),          # sin_b
            ],
            out_specs=pl.BlockSpec((1, N, C), lambda b: (b, 0, 0)),
        ),
        compiler_params=pltpu.CompilerParams(dimension_semantics=("parallel",)),
        cost_estimate=pl.CostEstimate(
            flops=int(flops), transcendentals=int(B * num_heads * N * N),
            bytes_accessed=int(bytes_acc)),
    )(qkv, cos, sin_a, sin_b)


# ----------------------------------------------------------------------------
# Kernel 3: fused  proj -> +residual -> LayerNorm1   (eps=1e-5, torch semantics)
# ----------------------------------------------------------------------------
def proj_add_ln_kernel(a_ref, w_ref, b_ref, r_ref, g_ref, bb_ref, o_ref, *, eps):
    y = jax.lax.dot_general(a_ref[...], w_ref[...], (((1,), (1,)), ((), ())),
                            preferred_element_type=jnp.float32)
    y = y + b_ref[...] + r_ref[...].astype(jnp.float32)   # proj bias + residual
    mean = jnp.mean(y, axis=-1, keepdims=True)
    yc = y - mean
    var = jnp.mean(yc * yc, axis=-1, keepdims=True)
    inv = jax.lax.rsqrt(var + eps)
    o_ref[...] = (yc * inv * g_ref[...] + bb_ref[...]).astype(o_ref.dtype)


def proj_add_ln(attn2d, w, b, resid, gamma, beta, *, eps=1e-5, tm=128):
    M, C = attn2d.shape
    tm = min(tm, M)
    kernel = functools.partial(proj_add_ln_kernel, eps=eps)
    flops = 2 * M * C * C + 10 * M * C
    bytes_acc = (attn2d.size + w.size + resid.size + M * C + 4 * C) * 4
    return pl.pallas_call(
        kernel,
        out_shape=jax.ShapeDtypeStruct((M, C), attn2d.dtype),
        grid_spec=pltpu.PrefetchScalarGridSpec(
            num_scalar_prefetch=0,
            grid=(pl.cdiv(M, tm),),
            in_specs=[
                pl.BlockSpec((tm, C), lambda i: (i, 0)),       # attention output tile
                pl.BlockSpec((C, C), lambda i: (0, 0)),        # W_proj (torch layout)
                pl.BlockSpec((1, C), lambda i: (0, 0)),        # b_proj
                pl.BlockSpec((tm, C), lambda i: (i, 0)),       # residual (x) tile
                pl.BlockSpec((1, C), lambda i: (0, 0)),        # ln1 gamma
                pl.BlockSpec((1, C), lambda i: (0, 0)),        # ln1 beta
            ],
            out_specs=pl.BlockSpec((tm, C), lambda i: (i, 0)),
        ),
        compiler_params=pltpu.CompilerParams(dimension_semantics=("parallel",)),
        cost_estimate=pl.CostEstimate(flops=int(flops), transcendentals=int(M),
                                      bytes_accessed=int(bytes_acc)),
    )(attn2d, w, b.reshape(1, C), resid, gamma.reshape(1, C), beta.reshape(1, C))


# ----------------------------------------------------------------------------
# Kernel 4: fused  fc1 -> ReLU -> fc2 -> +residual -> LayerNorm2
#   Full hidden dim per step (H=512 fits easily in VMEM), no reduction axis /
#   accumulator scratch.
#   TODO(synk): re-introduce a hidden-dim reduction grid axis only for much
#               larger H (multi-MiB weight tiles).
# ----------------------------------------------------------------------------
def mlp_add_ln_kernel(x_ref, w1_ref, b1_ref, w2_ref, b2_ref, g_ref, bb_ref,
                      o_ref, *, eps):
    x = x_ref[...].astype(jnp.float32)
    h = jax.lax.dot_general(x, w1_ref[...], (((1,), (1,)), ((), ())),
                            preferred_element_type=jnp.float32)
    h = jnp.maximum(h + b1_ref[...], 0.0)                   # fc1 + ReLU
    y = jax.lax.dot_general(h, w2_ref[...], (((1,), (1,)), ((), ())),
                            preferred_element_type=jnp.float32)
    y = y + b2_ref[...] + x                                 # fc2 bias + residual
    mean = jnp.mean(y, axis=-1, keepdims=True)
    yc = y - mean
    var = jnp.mean(yc * yc, axis=-1, keepdims=True)
    inv = jax.lax.rsqrt(var + eps)
    o_ref[...] = (yc * inv * g_ref[...] + bb_ref[...]).astype(o_ref.dtype)


def mlp_add_ln(x, w1, b1, w2, b2, gamma, beta, *, eps=1e-5, tm=128):
    """x: (M, C); w1: (H, C); b1: (H,); w2: (C, H); b2: (C,)."""
    M, C = x.shape
    H = w1.shape[0]
    tm = min(tm, M)
    kernel = functools.partial(mlp_add_ln_kernel, eps=eps)
    flops = 2 * M * (C * H + H * C) + 10 * M * C
    bytes_acc = (x.size + w1.size + w2.size + b1.size + b2.size
                 + M * C + 2 * C) * 4
    return pl.pallas_call(
        kernel,
        out_shape=jax.ShapeDtypeStruct((M, C), x.dtype),
        grid_spec=pltpu.PrefetchScalarGridSpec(
            num_scalar_prefetch=0,
            grid=(pl.cdiv(M, tm),),
            in_specs=[
                pl.BlockSpec((tm, C), lambda i: (i, 0)),       # x1 row tile (also residual)
                pl.BlockSpec((H, C), lambda i: (0, 0)),        # W1 (torch layout)
                pl.BlockSpec((1, H), lambda i: (0, 0)),        # b1
                pl.BlockSpec((C, H), lambda i: (0, 0)),        # W2 (torch layout)
                pl.BlockSpec((1, C), lambda i: (0, 0)),        # b2
                pl.BlockSpec((1, C), lambda i: (0, 0)),        # ln2 gamma
                pl.BlockSpec((1, C), lambda i: (0, 0)),        # ln2 beta
            ],
            out_specs=pl.BlockSpec((tm, C), lambda i: (i, 0)),
        ),
        compiler_params=pltpu.CompilerParams(dimension_semantics=("parallel",)),
        cost_estimate=pl.CostEstimate(flops=int(flops), transcendentals=int(M),
                                      bytes_accessed=int(bytes_acc)),
    )(x, w1, b1.reshape(1, H), w2, b2.reshape(1, C),
      gamma.reshape(1, C), beta.reshape(1, C))


# ----------------------------------------------------------------------------
# Full TransformerLayer forward (4 pallas_calls, no XLA-level transposes)
# ----------------------------------------------------------------------------
def transformer_layer_forward(x, params, *, num_heads, tm=128):
    B, N, C = x.shape
    assert C % num_heads == 0
    Dh = C // num_heads
    M = B * N
    x2d = x.reshape(M, C)

    # ---- attention branch ----
    qkv = qkv_linear(x2d, params["w_qkv"], params["b_qkv"], tm=tm)      # (M, 3C)
    qkv = qkv.reshape(B, N, 3 * C)                                      # free reshape
    attn = attention(qkv, params["rope_cos"], params["rope_sin_a"],
                     params["rope_sin_b"], num_heads=num_heads,
                     scale=float(Dh) ** -0.5)                           # (B, N, C)
    x1 = proj_add_ln(attn.reshape(M, C), params["w_proj"], params["b_proj"],
                     x2d, params["ln1_g"], params["ln1_b"], tm=tm)      # LN1(x+proj)

    # ---- MLP branch ----
    out = mlp_add_ln(x1, params["w_fc1"], params["b_fc1"],
                     params["w_fc2"], params["b_fc2"],
                     params["ln2_g"], params["ln2_b"], tm=tm)           # LN2(x1+mlp)
    return out.reshape(B, N, C)


# ----------------------------------------------------------------------------
# Pure-JAX reference (same math as the PyTorch forward with all dropout = 0)
# ----------------------------------------------------------------------------
def reference_forward(x, p, *, num_heads, eps=1e-5):
    B, N, C = x.shape
    Dh = C // num_heads
    x2 = x.reshape(B * N, C)

    qkv = x2 @ p["w_qkv"].T + p["b_qkv"]
    qkv = qkv.reshape(B, N, 3, num_heads, Dh).transpose(2, 0, 3, 1, 4)
    q, k, v = qkv[0], qkv[1], qkv[2]                                    # (B,H,N,Dh)
    cos, sin = rope_tables(N, Dh)

    def rope(t):
        t1, t2 = t[..., : Dh // 2], t[..., Dh // 2:]
        return t * cos + jnp.concatenate([-t2, t1], axis=-1) * sin

    q, k = rope(q), rope(k)
    s = jnp.einsum("bhqd,bhkd->bhqk", q, k) * (Dh ** -0.5)
    a = jax.nn.softmax(s, axis=-1)
    o = jnp.einsum("bhqk,bhkd->bhqd", a, v)
    o = o.transpose(0, 2, 1, 3).reshape(B * N, C)
    proj = o @ p["w_proj"].T + p["b_proj"]

    def ln(t, g, b):
        m = t.mean(-1, keepdims=True)
        var = ((t - m) ** 2).mean(-1, keepdims=True)
        return (t - m) / jnp.sqrt(var + eps) * g + b

    x1 = ln(x2 + proj, p["ln1_g"], p["ln1_b"])
    h = jnp.maximum(x1 @ p["w_fc1"].T + p["b_fc1"], 0.0)
    h = h @ p["w_fc2"].T + p["b_fc2"]
    out = ln(x1 + h, p["ln2_g"], p["ln2_b"])
    return out.reshape(B, N, C)


def torch_linear_init(key, out_features, in_features):
    """Deterministic re-implementation of nn.Linear default init."""
    bound = 1.0 / (in_features ** 0.5)
    kw, kb = jax.random.split(key)
    w = jax.random.uniform(kw, (out_features, in_features),
                           minval=-bound, maxval=bound, dtype=jnp.float32)
    b = jax.random.uniform(kb, (out_features,),
                           minval=-bound, maxval=bound, dtype=jnp.float32)
    return w, b


if __name__ == "__main__":
    key = jax.random.PRNGKey(0)
    k_x, k_qkv, k_proj, k_fc1, k_fc2 = jax.random.split(key, 5)

    # Lane-dense shapes: hidden_size=128, heads=4 (head_dim=32),
    # mlp_ratio=4 -> mlp_hidden=512, batch=2, seq=128.
    B, N, C = 2, 128, 128
    num_heads = 4
    mlp_ratio = 4
    H = C * mlp_ratio

    x = jax.random.normal(k_x, (B, N, C), dtype=jnp.float32)

    w_qkv, b_qkv = torch_linear_init(k_qkv, 3 * C, C)
    w_proj, b_proj = torch_linear_init(k_proj, C, C)
    w_fc1, b_fc1 = torch_linear_init(k_fc1, H, C)
    w_fc2, b_fc2 = torch_linear_init(k_fc2, C, H)

    # RoPE tables: f32, expanded to (N, C) lane-dense, sign/mask folded in.
    rope_cos, rope_sin_a, rope_sin_b = build_rope_lane_tables(
        N, C // num_heads, num_heads)

    params = {
        "w_qkv": w_qkv, "b_qkv": b_qkv,
        "w_proj": w_proj, "b_proj": b_proj,
        "ln1_g": jnp.ones((C,), jnp.float32), "ln1_b": jnp.zeros((C,), jnp.float32),
        "w_fc1": w_fc1, "b_fc1": b_fc1,
        "w_fc2": w_fc2, "b_fc2": b_fc2,
        "ln2_g": jnp.ones((C,), jnp.float32), "ln2_b": jnp.zeros((C,), jnp.float32),
        "rope_cos": rope_cos, "rope_sin_a": rope_sin_a, "rope_sin_b": rope_sin_b,
    }

    fwd = jax.jit(functools.partial(transformer_layer_forward,
                                    num_heads=num_heads))
    y = fwd(x, params)
    y = jax.block_until_ready(y)

    y_ref = reference_forward(x, params, num_heads=num_heads)
    err = float(jnp.max(jnp.abs(y - y_ref)))
    assert err < 2e-3, f"mismatch vs reference: max abs err = {err}"
    print("KERNEL_OK")
</pallas_src>

<mosaic_0001>
module attributes {stable_mosaic.version = 11 : i64} {
  func.func @probe_kernel(%arg0: memref<8x128xf32, #tpu.memory_space<vmem>>, %arg1: memref<8x128xf32, #tpu.memory_space<vmem>>) attributes {dimension_semantics = [], scalar_prefetch = 0 : i64, scratch_operands = 0 : i64, tpu.core_type = #tpu.core_type<tc>} {
    %c0 = arith.constant 0 : index
    %c0_0 = arith.constant 0 : index
    %0 = vector.load %arg0[%c0, %c0_0] : memref<8x128xf32, #tpu.memory_space<vmem>>, vector<8x128xf32>
    %c1_i32 = arith.constant 1 : i32
    %1 = tpu.dynamic_rotate %0 by %c1_i32 dim 1 : vector<8x128xf32>, i32 -> vector<8x128xf32>
    %c0_1 = arith.constant 0 : index
    %c0_2 = arith.constant 0 : index
    %2 = vector.load %arg1[%c0_1, %c0_2] : memref<8x128xf32, #tpu.memory_space<vmem>>, vector<8x128xf32>
    tpu.vector_store %arg1[%c0_1, %c0_2], %1 {strides = array<i32>} : memref<8x128xf32, #tpu.memory_space<vmem>>, vector<8x128xf32>,
    return
  }
}

</mosaic_0001>

<bundles_post_ra>
// kernel: tpu_custom_call.1
= control target key start
LH: loop header
LB: loop body
LE: loop exit
PB: predicated region body
PF: predicated region fallthrough
CT: control target
= control target key end

     0   :  { %6 = vsyncpa [#allocation3], 0  ;;  %s118_s0 = inlined_call_operand.hbm [shape: f32[8,128], index: 0, kind: input, shape index: {}]   ;;  %s119_s1 = inlined_call_operand.hbm [shape: f32[8,128], index: 1, kind: output, shape index: {}]  }
   0x1   :  { %7 = vsyncpa [#allocation4], 0  ;;  %s13_s8 = sshll.u32 %s118_s0, 4  ;;  %s99_s9 = smov [#allocation2]   ;;  %s14_s8 = int_to_ptr.hbm [resolvable:$true] %s13_s8 }
   0x2   :  { %s15_s10 = sshll.u32 %s99_s9, 4  ;;  %s16_s10 = int_to_ptr.vmem [resolvable:$true] %s15_s10 }
   0x3   :  { %18 = dma.hbm_to_vmem [thread:$0]  %s14_s8, 128, %s16_s10, [#allocation3]  }
   0x4   :  { %95 = dma.done.wait [#allocation3], 128  }
   0x5   :  { %96 = vsyncadd [#allocation3], 4294967168  ;;  %v23_v0 = vld [vmem:[#allocation2] sm:$0xff]  ;;  %s100_s11 = smov 1   ;;  %s101_s12 = smov [#allocation5]  }
   0x6   :  { %24 = vrot.lane.b32.xlu0 %v23_v0, %s100_s11  ;;  %s32_s13 = sshll.u32 %s101_s12, 4  ;;  %s34_s16 = sshll.u32 %s119_s1, 4  ;;  %s33_s13 = int_to_ptr.vmem [resolvable:$true] %s32_s13  ;;  %s35_s16 = int_to_ptr.hbm [resolvable:$true] %s34_s16 }
  0x78   :  { %v25_v1 = vpop.permute.xlu0 %24 }
  0x79   :  { %26 = vst [vmem:[#allocation5] sm:$0xff] %v25_v1 }
  0x7a   :  { %37 = dma.vmem_to_hbm [thread:$0]  %s33_s13, 128, %s35_s16, [#allocation4]  }
  0x7b   :  { %97 = dma.done.wait [#allocation4], 128  }
  0x7c   :  { %98 = vsyncadd [#allocation4], 4294967168 }
  0x7d   :  { %42 = vsyncpa [#allocation3], 1 }
  0x7e   :  { %43 = vsyncpa [#allocation4], 1 }

</bundles_post_ra>
